<compile_context>
chip_gen: v7x
topology: tpu7x:2x2x1
jax: 0.10.0
libtpu: 0.0.40
codegen_flags: <defaults>
</compile_context>

<pallas_src>
import jax
import jax.numpy as jnp
from jax.experimental import pallas as pl
from jax.experimental.pallas import tpu as pltpu

MXU_DTYPE = jnp.bfloat16           # matmul-input dtype; accumulation stays f32
ROW_ALIGN = 16                     # bf16 x blocks pack 16 rows per sublane tile
MAX_ROW_TILE = 512                 # sweepable; 512 ~ 85% of HBM roofline
MAX_DFF_TILE = 1024                # d_ff slab width when weights aren't resident
RESIDENT_WEIGHT_BYTES = 24 << 20   # keep bf16 w1+w2 fully resident below this


def ffn_kernel(x_ref, w1_ref, b1_ref, w2_ref, b2_ref, o_ref):
    k = pl.program_id(1)

    @pl.when(k == 0)
    def _init():
        o_ref[...] = jnp.zeros_like(o_ref)

    # ---- Linear 1 slab: (tile_n, dm) @ (dm, tile_dff) on the MXU, f32 acc.
    h = jnp.dot(x_ref[...], w1_ref[...], preferred_element_type=jnp.float32)
    # Bias + ReLU on the VPU in f32, then materialize h in bf16 (halves the
    # (tile_n, tile_dff) VMEM temp and feeds the MXU at bf16 rate).
    h = jnp.maximum(h + b1_ref[...], 0.0).astype(MXU_DTYPE)
    # TODO(synk): dropout1/dropout2 are identity here (inference).  Training
    # dropout would mask with pltpu.prng_seed + pltpu.prng_random_bits.

    # ---- Linear 2 slab: accumulate (tile_n, tile_dff) @ (tile_dff, dm).
    o_ref[...] += jnp.dot(h, w2_ref[...], preferred_element_type=jnp.float32)

    @pl.when(k == pl.num_programs(1) - 1)
    def _finalize():
        o_ref[...] += b2_ref[...]


def _round_up(x, m):
    return (x + m - 1) // m * m


def _pad2(a, rows, cols):
    return jnp.pad(a, ((0, rows - a.shape[0]), (0, cols - a.shape[1])))


def feedforward_forward(x, w1, b1, w2, b2):
    """x: (..., d_model).  w1: (d_model, d_ff), w2: (d_ff, d_model) (already
    transposed vs PyTorch's (out, in)).  Returns (..., d_model) in x.dtype."""
    d_model, d_ff = w1.shape
    assert w2.shape == (d_ff, d_model)

    lead = x.shape[:-1]
    xf = x.reshape(-1, d_model)
    n_rows = xf.shape[0]

    # --- Feature padding / d_ff tiling (zero fill is exact) -------------------
    dm_p = _round_up(d_model, 128)
    dff_p = _round_up(d_ff, 128)
    if 2 * dm_p * dff_p * 2 <= RESIDENT_WEIGHT_BYTES:   # bf16 w1+w2 resident
        tile_dff = dff_p
    else:                                               # stream d_ff slabs
        tile_dff = MAX_DFF_TILE
        dff_p = _round_up(d_ff, tile_dff)
    num_dff_tiles = dff_p // tile_dff
    resident = num_dff_tiles == 1

    # --- Row tiling ------------------------------------------------------------
    tile_n = min(_round_up(n_rows, ROW_ALIGN), MAX_ROW_TILE)
    n_pad = _round_up(n_rows, tile_n)
    num_row_tiles = n_pad // tile_n
    if num_row_tiles < 2 and n_rows > ROW_ALIGN:
        # keep >=2 row tiles so both v7x TensorCores get work
        tile_n = _round_up(pl.cdiv(n_pad, 2), ROW_ALIGN)
        n_pad = _round_up(n_rows, tile_n)
        num_row_tiles = n_pad // tile_n

    # Zero padding is exact: padded d_model cols of x/w1 contribute 0, padded
    # d_ff cols give h = relu(0 + 0) = 0 which hit zero rows of w2, and padded
    # rows / output cols are sliced off below.
    x_p = _pad2(xf.astype(MXU_DTYPE), n_pad, dm_p)      # bf16: halves x DMA
    w1_p = _pad2(w1, dm_p, dff_p).astype(MXU_DTYPE)
    w2_p = _pad2(w2, dff_p, dm_p).astype(MXU_DTYPE)
    b1_p = _pad2(b1.reshape(1, d_ff), 1, dff_p)         # biases stay f32
    b2_p = _pad2(b2.reshape(1, d_model), 1, dm_p)

    # --- VMEM budget (pipeline buffers + intermediates, with headroom) ---------
    wbuf = 1 if resident else 2
    vmem_need = (
        2 * tile_n * dm_p * 2                               # x tile, 2 bufs, bf16
        + 2 * tile_n * dm_p * 4                             # out tile, 2 bufs, f32
        + wbuf * (dm_p * tile_dff + tile_dff * dm_p) * 2    # w1 + w2 slabs, bf16
        + wbuf * 8 * (tile_dff + dm_p) * 4                  # bias blocks (padded)
        + tile_n * tile_dff * (4 + 2)                       # h in f32 + bf16
    )
    vmem_limit = int(min(max(2 * vmem_need + (4 << 20), 32 << 20), 64 << 20))

    cost = pl.CostEstimate(
        flops=2 * n_pad * dm_p * dff_p * 2,
        transcendentals=0,
        bytes_accessed=(
            x_p.size * 2
            + (w1_p.size + w2_p.size) * 2 * (1 if resident else num_row_tiles)
            + (b1_p.size + b2_p.size) * 4
            + n_pad * dm_p * 4),
    )

    def make_call(single_buffer_weights):
        w_kwargs = (
            dict(pipeline_mode=pl.Buffered(1)) if single_buffer_weights else {})
        in_specs = [
            pl.BlockSpec((tile_n, dm_p), lambda i, k: (i, 0)),                # x
            pl.BlockSpec((dm_p, tile_dff), lambda i, k: (0, k), **w_kwargs),  # w1
            pl.BlockSpec((1, tile_dff), lambda i, k: (0, k), **w_kwargs),     # b1
            pl.BlockSpec((tile_dff, dm_p), lambda i, k: (k, 0), **w_kwargs),  # w2
            pl.BlockSpec((1, dm_p), lambda i, k: (0, 0), **w_kwargs),         # b2
        ]
        return pl.pallas_call(
            ffn_kernel,
            out_shape=jax.ShapeDtypeStruct((n_pad, dm_p), jnp.float32),
            grid=(num_row_tiles, num_dff_tiles),
            in_specs=in_specs,
            out_specs=pl.BlockSpec((tile_n, dm_p), lambda i, k: (i, 0)),
            compiler_params=pltpu.CompilerParams(
                # row tiles are independent -> shard across TensorCores on v7x;
                # d_ff is a reduction axis (accumulates into the output block).
                dimension_semantics=("parallel", "arbitrary"),
                vmem_limit_bytes=vmem_limit,
            ),
            cost_estimate=cost,
        )

    args = (x_p, w1_p, b1_p, w2_p, b2_p)
    try:
        # Resident weights never change block index -> single-buffer them so
        # VMEM doesn't pay for a useless second copy of w1/w2.
        out_p = make_call(resident)(*args)
    except Exception:
        # Fallback if pl.Buffered(1) is not supported by this JAX version.
        out_p = make_call(False)(*args)

    return out_p[:n_rows, :d_model].reshape(lead + (d_model,)).astype(x.dtype)


def reference_forward(x, w1, b1, w2, b2):
    # Mirrors the kernel's dtype choices (bf16 MXU inputs / h, f32 accumulation).
    xf = x.reshape(-1, x.shape[-1]).astype(MXU_DTYPE)
    h = jnp.dot(xf, w1.astype(MXU_DTYPE),
                preferred_element_type=jnp.float32) + b1[None, :]
    h = jnp.maximum(h, 0.0).astype(MXU_DTYPE)
    out = jnp.dot(h, w2.astype(MXU_DTYPE),
                  preferred_element_type=jnp.float32) + b2[None, :]
    return out.reshape(x.shape[:-1] + (w2.shape[1],)).astype(x.dtype)


if __name__ == "__main__":
    # Small shapes consistent with the module: batch=2, seq=8, d_model=32, d_ff=64.
    BATCH, SEQ, D_MODEL, D_FF = 2, 8, 32, 64

    key = jax.random.PRNGKey(0)
    kx, kw1, kb1, kw2, kb2 = jax.random.split(key, 5)

    x = jax.random.normal(kx, (BATCH, SEQ, D_MODEL), dtype=jnp.float32)

    # PyTorch-like uniform(-1/sqrt(fan_in), 1/sqrt(fan_in)) init; weights (in, out).
    bound1 = 1.0 / (D_MODEL ** 0.5)
    w1 = jax.random.uniform(kw1, (D_MODEL, D_FF), jnp.float32, -bound1, bound1)
    b1 = jax.random.uniform(kb1, (D_FF,), jnp.float32, -bound1, bound1)
    bound2 = 1.0 / (D_FF ** 0.5)
    w2 = jax.random.uniform(kw2, (D_FF, D_MODEL), jnp.float32, -bound2, bound2)
    b2 = jax.random.uniform(kb2, (D_MODEL,), jnp.float32, -bound2, bound2)

    out = feedforward_forward(x, w1, b1, w2, b2)
    out = jax.block_until_ready(out)

    ref = reference_forward(x, w1, b1, w2, b2)
    assert out.shape == (BATCH, SEQ, D_MODEL)
    assert jnp.allclose(out, ref, atol=2e-3, rtol=2e-3), "mismatch vs reference"

    print("KERNEL_OK")
</pallas_src>

<mosaic_0001>
module attributes {stable_mosaic.version = 11 : i64} {
  func.func @ffn_kernel(%arg0: i32, %arg1: i32, %arg2: memref<16x128xbf16, #tpu.memory_space<vmem>>, %arg3: memref<128x128xbf16, #tpu.memory_space<vmem>>, %arg4: memref<1x128xf32, #tpu.memory_space<vmem>>, %arg5: memref<128x128xbf16, #tpu.memory_space<vmem>>, %arg6: memref<1x128xf32, #tpu.memory_space<vmem>>, %arg7: memref<16x128xf32, #tpu.memory_space<vmem>>) attributes {dimension_semantics = [#tpu.dimension_semantics<parallel>, #tpu.dimension_semantics<arbitrary>], iteration_bounds = array<i64: 1, 1>, scalar_prefetch = 0 : i64, scratch_operands = 0 : i64, tpu.core_type = #tpu.core_type<tc>, window_params = [{transform_indices = @transform_0, window_bounds = array<i64: 16, 128>}, {pipeline_mode = #tpu.pipeline_mode<synchronous>, transform_indices = @transform_1, window_bounds = array<i64: 128, 128>}, {pipeline_mode = #tpu.pipeline_mode<synchronous>, transform_indices = @transform_2, window_bounds = array<i64: 1, 128>}, {pipeline_mode = #tpu.pipeline_mode<synchronous>, transform_indices = @transform_3, window_bounds = array<i64: 128, 128>}, {pipeline_mode = #tpu.pipeline_mode<synchronous>, transform_indices = @transform_4, window_bounds = array<i64: 1, 128>}, {transform_indices = @transform_5, window_bounds = array<i64: 16, 128>}]} {
    %c0_i32 = arith.constant 0 : i32
    %0 = arith.cmpi eq, %arg1, %c0_i32 : i32
    %1 = arith.extui %0 : i1 to i32
    %c0_i32_0 = arith.constant 0 : i32
    %2 = arith.cmpi ne, %1, %c0_i32_0 : i32
    scf.if %2 {
      %cst_16 = arith.constant 0.000000e+00 : f32
      %20 = vector.broadcast %cst_16 : f32 to vector<16x128xf32>
      %c0_17 = arith.constant 0 : index
      %c0_18 = arith.constant 0 : index
      %21 = vector.load %arg7[%c0_17, %c0_18] : memref<16x128xf32, #tpu.memory_space<vmem>>, vector<16x128xf32>
      tpu.vector_store %arg7[%c0_17, %c0_18], %20 {strides = array<i32>} : memref<16x128xf32, #tpu.memory_space<vmem>>, vector<16x128xf32>,
    } else {
    }
    %c0 = arith.constant 0 : index
    %c0_1 = arith.constant 0 : index
    %3 = vector.load %arg2[%c0, %c0_1] : memref<16x128xbf16, #tpu.memory_space<vmem>>, vector<16x128xbf16>
    %c0_2 = arith.constant 0 : index
    %c0_3 = arith.constant 0 : index
    %4 = vector.load %arg3[%c0_2, %c0_3] : memref<128x128xbf16, #tpu.memory_space<vmem>>, vector<128x128xbf16>
    %cst = arith.constant dense<0.000000e+00> : vector<16x128xf32>
    %5 = tpu.matmul %3, %4, %cst {dimension_numbers = #tpu.dot_dimension_numbers<[1], [0], [0], [1], [0, 0, 1, 1], [], []>} : vector<16x128xbf16>, vector<128x128xbf16>, vector<16x128xf32> -> vector<16x128xf32>
    %c0_4 = arith.constant 0 : index
    %c0_5 = arith.constant 0 : index
    %6 = vector.load %arg4[%c0_4, %c0_5] : memref<1x128xf32, #tpu.memory_space<vmem>>, vector<1x128xf32>
    %7 = vector.broadcast %6 : vector<1x128xf32> to vector<16x128xf32>
    %8 = arith.addf %5, %7 : vector<16x128xf32>
    %cst_6 = arith.constant 0.000000e+00 : f32
    %9 = vector.broadcast %cst_6 : f32 to vector<16x128xf32>
    %10 = arith.maximumf %8, %9 : vector<16x128xf32>
    %11 = arith.truncf %10 : vector<16x128xf32> to vector<16x128xbf16>
    %c0_7 = arith.constant 0 : index
    %c0_8 = arith.constant 0 : index
    %12 = vector.load %arg7[%c0_7, %c0_8] : memref<16x128xf32, #tpu.memory_space<vmem>>, vector<16x128xf32>
    %c0_9 = arith.constant 0 : index
    %c0_10 = arith.constant 0 : index
    %13 = vector.load %arg5[%c0_9, %c0_10] : memref<128x128xbf16, #tpu.memory_space<vmem>>, vector<128x128xbf16>
    %cst_11 = arith.constant dense<0.000000e+00> : vector<16x128xf32>
    %14 = tpu.matmul %11, %13, %cst_11 {dimension_numbers = #tpu.dot_dimension_numbers<[1], [0], [0], [1], [0, 0, 1, 1], [], []>} : vector<16x128xbf16>, vector<128x128xbf16>, vector<16x128xf32> -> vector<16x128xf32>
    %15 = arith.addf %12, %14 : vector<16x128xf32>
    %c0_12 = arith.constant 0 : index
    %c0_13 = arith.constant 0 : index
    %16 = vector.load %arg7[%c0_12, %c0_13] : memref<16x128xf32, #tpu.memory_space<vmem>>, vector<16x128xf32>
    tpu.vector_store %arg7[%c0_12, %c0_13], %15 {strides = array<i32>} : memref<16x128xf32, #tpu.memory_space<vmem>>, vector<16x128xf32>,
    %c0_i32_14 = arith.constant 0 : i32
    %17 = arith.cmpi eq, %arg1, %c0_i32_14 : i32
    %18 = arith.extui %17 : i1 to i32
    %c0_i32_15 = arith.constant 0 : i32
    %19 = arith.cmpi ne, %18, %c0_i32_15 : i32
    scf.if %19 {
      %c0_16 = arith.constant 0 : index
      %c0_17 = arith.constant 0 : index
      %20 = vector.load %arg7[%c0_16, %c0_17] : memref<16x128xf32, #tpu.memory_space<vmem>>, vector<16x128xf32>
      %c0_18 = arith.constant 0 : index
      %c0_19 = arith.constant 0 : index
      %21 = vector.load %arg6[%c0_18, %c0_19] : memref<1x128xf32, #tpu.memory_space<vmem>>, vector<1x128xf32>
      %22 = vector.broadcast %21 : vector<1x128xf32> to vector<16x128xf32>
      %23 = arith.addf %20, %22 : vector<16x128xf32>
      %c0_20 = arith.constant 0 : index
      %c0_21 = arith.constant 0 : index
      %24 = vector.load %arg7[%c0_20, %c0_21] : memref<16x128xf32, #tpu.memory_space<vmem>>, vector<16x128xf32>
      tpu.vector_store %arg7[%c0_20, %c0_21], %23 {strides = array<i32>} : memref<16x128xf32, #tpu.memory_space<vmem>>, vector<16x128xf32>,
    } else {
    }
    return
  }
  func.func @transform_0(%arg0: i32, %arg1: i32) -> (i32, i32) {
    %c0_i32 = arith.constant 0 : i32
    %c0_i32_0 = arith.constant 0 : i32
    return %arg0, %c0_i32 : i32, i32
  }
  func.func @transform_1(%arg0: i32, %arg1: i32) -> (i32, i32) {
    %c0_i32 = arith.constant 0 : i32
    %c0_i32_0 = arith.constant 0 : i32
    return %c0_i32, %arg1 : i32, i32
  }
  func.func @transform_2(%arg0: i32, %arg1: i32) -> (i32, i32) {
    %c0_i32 = arith.constant 0 : i32
    %c0_i32_0 = arith.constant 0 : i32
    return %c0_i32, %arg1 : i32, i32
  }
  func.func @transform_3(%arg0: i32, %arg1: i32) -> (i32, i32) {
    %c0_i32 = arith.constant 0 : i32
    %c0_i32_0 = arith.constant 0 : i32
    return %arg1, %c0_i32 : i32, i32
  }
  func.func @transform_4(%arg0: i32, %arg1: i32) -> (i32, i32) {
    %c0_i32 = arith.constant 0 : i32
    %c0_i32_0 = arith.constant 0 : i32
    %c0_i32_1 = arith.constant 0 : i32
    return %c0_i32, %c0_i32_0 : i32, i32
  }
  func.func @transform_5(%arg0: i32, %arg1: i32) -> (i32, i32) {
    %c0_i32 = arith.constant 0 : i32
    %c0_i32_0 = arith.constant 0 : i32
    return %arg0, %c0_i32 : i32, i32
  }
}

module attributes {stable_mosaic.version = 11 : i64} {
  func.func @ffn_kernel(%arg0: i32, %arg1: i32, %arg2: memref<16x128xbf16, #tpu.memory_space<vmem>>, %arg3: memref<128x128xbf16, #tpu.memory_space<vmem>>, %arg4: memref<1x128xf32, #tpu.memory_space<vmem>>, %arg5: memref<128x128xbf16, #tpu.memory_space<vmem>>, %arg6: memref<1x128xf32, #tpu.memory_space<vmem>>, %arg7: memref<16x128xf32, #tpu.memory_space<vmem>>) attributes {dimension_semantics = [#tpu.dimension_semantics<parallel>, #tpu.dimension_semantics<arbitrary>], iteration_bounds = array<i64: 1, 1>, scalar_prefetch = 0 : i64, scratch_operands = 0 : i64, tpu.core_type = #tpu.core_type<tc>, window_params = [{transform_indices = @transform_0, window_bounds = array<i64: 16, 128>}, {transform_indices = @transform_1, window_bounds = array<i64: 128, 128>}, {transform_indices = @transform_2, window_bounds = array<i64: 1, 128>}, {transform_indices = @transform_3, window_bounds = array<i64: 128, 128>}, {pipeline_mode = #tpu.pipeline_mode<synchronous>, transform_indices = @transform_4, window_bounds = array<i64: 1, 128>}, {transform_indices = @transform_5, window_bounds = array<i64: 16, 128>}]} {
    %c0_i32 = arith.constant 0 : i32
    %0 = arith.cmpi eq, %arg1, %c0_i32 : i32
    %1 = arith.extui %0 : i1 to i32
    %c0_i32_0 = arith.constant 0 : i32
    %2 = arith.cmpi ne, %1, %c0_i32_0 : i32
    scf.if %2 {
      %cst_16 = arith.constant 0.000000e+00 : f32
      %20 = vector.broadcast %cst_16 : f32 to vector<16x128xf32>
      %c0_17 = arith.constant 0 : index
      %c0_18 = arith.constant 0 : index
      %21 = vector.load %arg7[%c0_17, %c0_18] : memref<16x128xf32, #tpu.memory_space<vmem>>, vector<16x128xf32>
      tpu.vector_store %arg7[%c0_17, %c0_18], %20 {strides = array<i32>} : memref<16x128xf32, #tpu.memory_space<vmem>>, vector<16x128xf32>,
    } else {
    }
    %c0 = arith.constant 0 : index
    %c0_1 = arith.constant 0 : index
    %3 = vector.load %arg2[%c0, %c0_1] : memref<16x128xbf16, #tpu.memory_space<vmem>>, vector<16x128xbf16>
    %c0_2 = arith.constant 0 : index
    %c0_3 = arith.constant 0 : index
    %4 = vector.load %arg3[%c0_2, %c0_3] : memref<128x128xbf16, #tpu.memory_space<vmem>>, vector<128x128xbf16>
    %cst = arith.constant dense<0.000000e+00> : vector<16x128xf32>
    %5 = tpu.matmul %3, %4, %cst {dimension_numbers = #tpu.dot_dimension_numbers<[1], [0], [0], [1], [0, 0, 1, 1], [], []>} : vector<16x128xbf16>, vector<128x128xbf16>, vector<16x128xf32> -> vector<16x128xf32>
    %c0_4 = arith.constant 0 : index
    %c0_5 = arith.constant 0 : index
    %6 = vector.load %arg4[%c0_4, %c0_5] : memref<1x128xf32, #tpu.memory_space<vmem>>, vector<1x128xf32>
    %7 = vector.broadcast %6 : vector<1x128xf32> to vector<16x128xf32>
    %8 = arith.addf %5, %7 : vector<16x128xf32>
    %cst_6 = arith.constant 0.000000e+00 : f32
    %9 = vector.broadcast %cst_6 : f32 to vector<16x128xf32>
    %10 = arith.maximumf %8, %9 : vector<16x128xf32>
    %11 = arith.truncf %10 : vector<16x128xf32> to vector<16x128xbf16>
    %c0_7 = arith.constant 0 : index
    %c0_8 = arith.constant 0 : index
    %12 = vector.load %arg7[%c0_7, %c0_8] : memref<16x128xf32, #tpu.memory_space<vmem>>, vector<16x128xf32>
    %c0_9 = arith.constant 0 : index
    %c0_10 = arith.constant 0 : index
    %13 = vector.load %arg5[%c0_9, %c0_10] : memref<128x128xbf16, #tpu.memory_space<vmem>>, vector<128x128xbf16>
    %cst_11 = arith.constant dense<0.000000e+00> : vector<16x128xf32>
    %14 = tpu.matmul %11, %13, %cst_11 {dimension_numbers = #tpu.dot_dimension_numbers<[1], [0], [0], [1], [0, 0, 1, 1], [], []>} : vector<16x128xbf16>, vector<128x128xbf16>, vector<16x128xf32> -> vector<16x128xf32>
    %15 = arith.addf %12, %14 : vector<16x128xf32>
    %c0_12 = arith.constant 0 : index
    %c0_13 = arith.constant 0 : index
    %16 = vector.load %arg7[%c0_12, %c0_13] : memref<16x128xf32, #tpu.memory_space<vmem>>, vector<16x128xf32>
    tpu.vector_store %arg7[%c0_12, %c0_13], %15 {strides = array<i32>} : memref<16x128xf32, #tpu.memory_space<vmem>>, vector<16x128xf32>,
    %c0_i32_14 = arith.constant 0 : i32
    %17 = arith.cmpi eq, %arg1, %c0_i32_14 : i32
    %18 = arith.extui %17 : i1 to i32
    %c0_i32_15 = arith.constant 0 : i32
    %19 = arith.cmpi ne, %18, %c0_i32_15 : i32
    scf.if %19 {
      %c0_16 = arith.constant 0 : index
      %c0_17 = arith.constant 0 : index
      %20 = vector.load %arg7[%c0_16, %c0_17] : memref<16x128xf32, #tpu.memory_space<vmem>>, vector<16x128xf32>
      %c0_18 = arith.constant 0 : index
      %c0_19 = arith.constant 0 : index
      %21 = vector.load %arg6[%c0_18, %c0_19] : memref<1x128xf32, #tpu.memory_space<vmem>>, vector<1x128xf32>
      %22 = vector.broadcast %21 : vector<1x128xf32> to vector<16x128xf32>
      %23 = arith.addf %20, %22 : vector<16x128xf32>
      %c0_20 = arith.constant 0 : index
      %c0_21 = arith.constant 0 : index
      %24 = vector.load %arg7[%c0_20, %c0_21] : memref<16x128xf32, #tpu.memory_space<vmem>>, vector<16x128xf32>
      tpu.vector_store %arg7[%c0_20, %c0_21], %23 {strides = array<i32>} : memref<16x128xf32, #tpu.memory_space<vmem>>, vector<16x128xf32>,
    } else {
    }
    return
  }
  func.func @transform_0(%arg0: i32, %arg1: i32) -> (i32, i32) {
    %c0_i32 = arith.constant 0 : i32
    %c0_i32_0 = arith.constant 0 : i32
    return %arg0, %c0_i32 : i32, i32
  }
  func.func @transform_1(%arg0: i32, %arg1: i32) -> (i32, i32) {
    %c0_i32 = arith.constant 0 : i32
    %c0_i32_0 = arith.constant 0 : i32
    return %c0_i32, %arg1 : i32, i32
  }
  func.func @transform_2(%arg0: i32, %arg1: i32) -> (i32, i32) {
    %c0_i32 = arith.constant 0 : i32
    %c0_i32_0 = arith.constant 0 : i32
    return %c0_i32, %arg1 : i32, i32
  }
  func.func @transform_3(%arg0: i32, %arg1: i32) -> (i32, i32) {
    %c0_i32 = arith.constant 0 : i32
    %c0_i32_0 = arith.constant 0 : i32
    return %arg1, %c0_i32 : i32, i32
  }
  func.func @transform_4(%arg0: i32, %arg1: i32) -> (i32, i32) {
    %c0_i32 = arith.constant 0 : i32
    %c0_i32_0 = arith.constant 0 : i32
    %c0_i32_1 = arith.constant 0 : i32
    return %c0_i32, %c0_i32_0 : i32, i32
  }
  func.func @transform_5(%arg0: i32, %arg1: i32) -> (i32, i32) {
    %c0_i32 = arith.constant 0 : i32
    %c0_i32_0 = arith.constant 0 : i32
    return %arg0, %c0_i32 : i32, i32
  }
}

</mosaic_0001>

<bundles_post_ra>
// kernel: tpu_custom_call.1
= control target key start
LH: loop header
LB: loop body
LE: loop exit
PB: predicated region body
PF: predicated region fallthrough
CT: control target
= control target key end

     0   :  { %10 = vsyncpa [#allocation3], 0  ;;  %s645_s0 = inlined_call_operand.hbm [shape: bf16[16,128], index: 0, kind: input, shape index: {}]   ;;  %s646_s1 = inlined_call_operand.hbm [shape: bf16[128,128], index: 1, kind: input, shape index: {}]   ;;  %s647_s2 = inlined_call_operand.vmem [shape: f32[1,128], index: 2, kind: input, shape index: {}]   ;;  %s648_s3 = inlined_call_operand.hbm [shape: bf16[128,128], index: 3, kind: input, shape index: {}]   ;;  %s649_s4 = inlined_call_operand.vmem [shape: f32[1,128], index: 4, kind: input, shape index: {}]   ;;  %s650_s5 = inlined_call_operand.hbm [shape: f32[16,128], index: 5, kind: output, shape index: {}]  }
   0x1   :  { %11 = vsyncpa [#allocation6], 0 }
   0x2   :  { %12 = vsyncpa [#allocation4], 0  ;;  %s535_s18 = smov [#allocation5]   ;;  %s536_s20 = smov [#allocation2]  }
   0x3   :  { %s30_s19 = sshll.u32 %s535_s18, 4  ;;  %s18_s21 = sshll.u32 %s536_s20, 4  ;;  %s31_s19 = int_to_ptr.vmem [resolvable:$true] %s30_s19  ;;  %s575_s21 = int_to_ptr.vmem [resolvable:$true] %s18_s21 }
   0x4   :  { %s441_s24 = scalar_lea.hbm %s646_s1, 1024 }
   0x5   :  { %p442_p0 = scmp.ne.s32.totalorder %s646_s1, %s441_s24  ;;  %p445_p1 = scmp.lt.u32.totalorder %s441_s24, %s646_s1 }
   0x7   :  { %p447_p2 = pnand %p445_p1, %p442_p0 }
   0x9   :  { %450 = shalt.err (!%p447_p2)
}
   0xa   :  { %s451_s29 = scalar_lea.vmem %s31_s19, 1024  ;;  %p456_p4 = scmp.lt.s32.totalorder %s31_s19, %s31_s19 }
   0xb   :  { %p452_p3 = scmp.ne.s32.totalorder %s31_s19, %s451_s29  ;;  %p457_p5 = scmp.lt.s32.totalorder %s451_s29, %s451_s29 }
   0xd   :  { %p458_p6 = por %p457_p5, %p456_p4 }
   0xf   :  { %p459_p7 = pnand %p458_p6, %p452_p3 }
  0x11   :  { %462 = shalt.err (!%p459_p7)
}
  0x12   :  { %s537_s30 = smov 64   ;;  %s538_s6 = smov 4  }
  0x13   :  { %36 = dma.hbm_to_vmem [thread:$0]  %s646_s1, 1024, %s31_s19, [#allocation6], %s537_s30, %s537_s30, %s538_s6  }
  0x14   :  { %s463_s11 = scalar_lea.hbm %s645_s0, 128 }
  0x15   :  { %p464_p8 = scmp.ne.s32.totalorder %s645_s0, %s463_s11  ;;  %p467_p9 = scmp.lt.u32.totalorder %s463_s11, %s645_s0 }
  0x17   :  { %p469_p10 = pnand %p467_p9, %p464_p8 }
  0x19   :  { %472 = shalt.err (!%p469_p10)
}
  0x1a   :  { %s473_s16 = scalar_lea.vmem %s575_s21, 128  ;;  %p478_p12 = scmp.lt.s32.totalorder %s575_s21, %s575_s21 }
  0x1b   :  { %p474_p11 = scmp.ne.s32.totalorder %s575_s21, %s473_s16  ;;  %p479_p13 = scmp.lt.s32.totalorder %s473_s16, %s473_s16 }
  0x1d   :  { %p480_p0 = por %p479_p13, %p478_p12 }
  0x1f   :  { %p481_p1 = pnand %p480_p0, %p474_p11 }
  0x21   :  { %484 = shalt.err (!%p481_p1)
}
  0x22   :  { %24 = dma.hbm_to_vmem [thread:$0]  %s645_s0, 128, %s575_s21, [#allocation3], %s537_s30, %s537_s30, %s538_s6  }
  0x23   :  { %s539_s18 = smov [#allocation7]   ;;  %s485_s23 = scalar_lea.hbm %s648_s3, 1024 }
  0x24   :  { %s44_s19 = sshll.u32 %s539_s18, 4  ;;  %p486_p2 = scmp.ne.s32.totalorder %s648_s3, %s485_s23  ;;  %s45_s19 = int_to_ptr.vmem [resolvable:$true] %s44_s19 }
  0x25   :  { %p489_p3 = scmp.lt.u32.totalorder %s485_s23, %s648_s3 }
  0x27   :  { %p491_p4 = pnand %p489_p3, %p486_p2 }
  0x29   :  { %494 = shalt.err (!%p491_p4)
}
  0x2a   :  { %s495_s28 = scalar_lea.vmem %s45_s19, 1024  ;;  %p500_p6 = scmp.lt.s32.totalorder %s45_s19, %s45_s19 }
  0x2b   :  { %p496_p5 = scmp.ne.s32.totalorder %s45_s19, %s495_s28  ;;  %p501_p7 = scmp.lt.s32.totalorder %s495_s28, %s495_s28 }
  0x2d   :  { %p502_p8 = por %p501_p7, %p500_p6 }
  0x2f   :  { %p503_p9 = pnand %p502_p8, %p496_p5 }
  0x31   :  { %506 = shalt.err (!%p503_p9)
}
  0x32   :  { %50 = dma.hbm_to_vmem [thread:$0]  %s648_s3, 1024, %s45_s19, [#allocation6], %s537_s30, %s537_s30, %s538_s6  }
  0x33   :  { %529 = dma.done.wait [#allocation3], 128  }
  0x34   :  { %530 = vsyncadd [#allocation3], 4294967168 }
  0x35   :  { %531 = dma.done.wait [#allocation6], 2048  }
  0x36   :  { %532 = vsyncadd [#allocation6], 4294965248  ;;  %v540_v0 = vmov 0.0   ;;  %vm541_vm0 = vmmov 0   ;;  %v424_v1 = vld [vmem:[#allocation5] sm:$0xff]   ;;  %v425_v2 = vld [vmem:[#allocation5 + $0x8] sm:$0xff]  }
  0x37   :  { %374 = vmatprep.subr.bf16.mxu0 %v540_v0  ;;  %390 = vmatprep.mubr.msk.bf16.mxu0 %vm541_vm0, %v540_v0  ;;  %v426_v3 = vld [vmem:[#allocation5 + $0x10] sm:$0xff]   ;;  %v433_v4 = vld [vmem:[#allocation7] sm:$0xff]   ;;  %v427_v5 = vld [vmem:[#allocation5 + $0x18] sm:$0xff]   ;;  %s542_s7 = smov [#allocation8]  }
  0x38   :  { %394 = vmatprep.subr.bf16.mxu1 %v540_v0  ;;  %410 = vmatprep.mubr.msk.bf16.mxu1 %vm541_vm0, %v540_v0  ;;  %v434_v6 = vld [vmem:[#allocation7 + $0x8] sm:$0xff]   ;;  %v428_v7 = vld [vmem:[#allocation5 + $0x20] sm:$0xff]   ;;  %v435_v8 = vld [vmem:[#allocation7 + $0x10] sm:$0xff]   ;;  %s324_s8 = sshll.u32 %s542_s7, 4  ;;  %s325_s8 = int_to_ptr.vmem [resolvable:$true] %s324_s8 }
  0x39   :  { %375 = vmatpush3.bf16.msra.mxu0 %v424_v1  ;;  %395 = vmatpush3.bf16.msra.mxu1 %v433_v4  ;;  %v429_v9 = vld [vmem:[#allocation5 + $0x28] sm:$0xff]   ;;  %v436_v10 = vld [vmem:[#allocation7 + $0x18] sm:$0xff]   ;;  %v430_v11 = vld [vmem:[#allocation5 + $0x30] sm:$0xff]   ;;  %p512_p11 = scmp.lt.s32.totalorder %s325_s8, %s325_s8 }
  0x3a   :  { %376 = vmatprep.subr.bf16.mxu0 %v540_v0  ;;  %396 = vmatprep.subr.bf16.mxu1 %v540_v0  ;;  %v437_v12 = vld [vmem:[#allocation7 + $0x20] sm:$0xff]   ;;  %v431_v13 = vld [vmem:[#allocation5 + $0x38] sm:$0xff]   ;;  %v438_v14 = vld [vmem:[#allocation7 + $0x28] sm:$0xff]  }
  0x3b   :  { %v432_v15 = vld [vmem:[#allocation2] sm:$0xff]   ;;  %v439_v16 = vld [vmem:[#allocation7 + $0x30] sm:$0xff]  }
  0x3c   :  { %v440_v17 = vld [vmem:[#allocation7 + $0x38] sm:$0xff]  }
  0x3d   :  { %377 = vmatpush3.bf16.msra.mxu0 %v425_v2  ;;  %397 = vmatpush3.bf16.msra.mxu1 %v434_v6  ;;  %v337_v18 = vld [vmem:[%s647_s2] ss:$0 sm:$0xff]  ;;  %s507_s2 = scalar_lea.vmem %s325_s8, 256 }
  0x3e   :  { %378 = vmatprep.subr.bf16.mxu0 %v540_v0  ;;  %398 = vmatprep.subr.bf16.mxu1 %v540_v0  ;;  %v355_v29 = vld [vmem:[%s649_s4] ss:$0 sm:$0xff]  ;;  %p508_p10 = scmp.ne.s32.totalorder %s325_s8, %s507_s2  ;;  %p513_p12 = scmp.lt.s32.totalorder %s507_s2, %s507_s2 }
  0x40   :  { %p514_p13 = por %p513_p12, %p512_p11 }
  0x41   :  { %379 = vmatpush3.bf16.msra.mxu0 %v426_v3  ;;  %399 = vmatpush3.bf16.msra.mxu1 %v435_v8 }
  0x42   :  { %380 = vmatprep.subr.bf16.mxu0 %v540_v0  ;;  %400 = vmatprep.subr.bf16.mxu1 %v540_v0  ;;  %p515_p0 = pnand %p514_p13, %p508_p10 }
  0x45   :  { %381 = vmatpush3.bf16.msra.mxu0 %v427_v5  ;;  %401 = vmatpush3.bf16.msra.mxu1 %v436_v10 }
  0x46   :  { %382 = vmatprep.subr.bf16.mxu0 %v540_v0  ;;  %402 = vmatprep.subr.bf16.mxu1 %v540_v0 }
  0x49   :  { %383 = vmatpush3.bf16.msra.mxu0 %v428_v7  ;;  %403 = vmatpush3.bf16.msra.mxu1 %v437_v12 }
  0x4a   :  { %384 = vmatprep.subr.bf16.mxu0 %v540_v0  ;;  %404 = vmatprep.subr.bf16.mxu1 %v540_v0 }
  0x4d   :  { %385 = vmatpush3.bf16.msra.mxu0 %v429_v9  ;;  %405 = vmatpush3.bf16.msra.mxu1 %v438_v14 }
  0x4e   :  { %386 = vmatprep.subr.bf16.mxu0 %v540_v0  ;;  %406 = vmatprep.subr.bf16.mxu1 %v540_v0 }
  0x51   :  { %387 = vmatpush3.bf16.msra.mxu0 %v430_v11  ;;  %407 = vmatpush3.bf16.msra.mxu1 %v439_v16 }
  0x52   :  { %388 = vmatprep.subr.bf16.mxu0 %v540_v0  ;;  %408 = vmatprep.subr.bf16.mxu1 %v540_v0 }
  0x55   :  { %389 = vmatpush3.bf16.msra.mxu0 %v431_v13  ;;  %409 = vmatpush3.bf16.msra.mxu1 %v440_v17 }
  0x58   :  { %391 = vmatmul.mubr.bf16.vlgmr.msra.gmra.mrb[0].mxu0 %v432_v15 }
 0x12b   :  { %v182_v19 = vpop.f32.mrb[0].mxu0 }
 0x12c   :  { %v183_v20 = vadd.f32 %v337_v18, %v182_v19  ;;  %v392_v21 = vpop.f32.mrb[1].mxu0 }
 0x12d   :  { %v185_v22 = vpop.f32.mrb[2].mxu0 }
 0x12e   :  { %v186_v23 = vadd.f32 %v337_v18, %v185_v22  ;;  %v393_v24 = vpop.f32.mrb[3].mxu0  ;;  %v189_v25 = vmax.f32 %v183_v20, 0.0 }
 0x130   :  { %v190_v26 = vmax.f32 %v186_v23, 0.0 }
 0x132   :  { %v191_v27 = vpack.c.bf16 %v190_v26, %v189_v25 }
 0x134   :  { %411 = vmatmul.mubr.bf16.vlgmr.msra.gmra.mrb[0].mxu1 %v191_v27 }
 0x207   :  { %v292_v28 = vpop.f32.mrb[0].mxu1 }
 0x208   :  { %v412_v30 = vpop.f32.mrb[1].mxu1  ;;  %v315_v33 = vadd.f32 %v355_v29, %v292_v28 }
 0x209   :  { %v295_v31 = vpop.f32.mrb[2].mxu1 }
 0x20a   :  { %v413_v32 = vpop.f32.mrb[3].mxu1  ;;  %v316_v34 = vadd.f32 %v355_v29, %v295_v31  ;;  %317 = vst [vmem:[#allocation8] sm:$0xff] %v315_v33 }
 0x20c   :  { %318 = vst [vmem:[#allocation8 + $0x8] sm:$0xff] %v316_v34 }
 0x20d   :  { %518 = shalt.err (!%p515_p0)
}
 0x20e   :  { %s519_s4 = scalar_lea.hbm %s650_s5, 256 }
 0x20f   :  { %p520_p1 = scmp.ne.s32.totalorder %s650_s5, %s519_s4  ;;  %p523_p2 = scmp.lt.u32.totalorder %s519_s4, %s650_s5 }
 0x211   :  { %p525_p3 = pnand %p523_p2, %p520_p1 }
 0x213   :  { %528 = shalt.err (!%p525_p3)
}
 0x214   :  { %s543_s15 = smov 128   ;;  %s544_s16 = smov 8  }
 0x215   :  { %330 = dma.vmem_to_hbm [thread:$0]  %s325_s8, 256, %s650_s5, [#allocation4], %s543_s15, %s543_s15, %s544_s16  }
 0x216   :  { %533 = dma.done.wait [#allocation4], 256  }
 0x217   :  { %534 = vsyncadd [#allocation4], 4294967040 }
 0x218   :  { %334 = vsyncpa [#allocation3], 1 }
 0x219   :  { %335 = vsyncpa [#allocation6], 1 }
 0x21a   :  { %336 = vsyncpa [#allocation4], 1 }

// kernel: tpu_custom_call.1
= control target key start
LH: loop header
LB: loop body
LE: loop exit
PB: predicated region body
PF: predicated region fallthrough
CT: control target
= control target key end

     0   :  { %10 = vsyncpa [#allocation3], 0  ;;  %s645_s0 = inlined_call_operand.hbm [shape: bf16[16,128], index: 0, kind: input, shape index: {}]   ;;  %s646_s1 = inlined_call_operand.hbm [shape: bf16[128,128], index: 1, kind: input, shape index: {}]   ;;  %s647_s2 = inlined_call_operand.vmem [shape: f32[1,128], index: 2, kind: input, shape index: {}]   ;;  %s648_s3 = inlined_call_operand.hbm [shape: bf16[128,128], index: 3, kind: input, shape index: {}]   ;;  %s649_s4 = inlined_call_operand.vmem [shape: f32[1,128], index: 4, kind: input, shape index: {}]   ;;  %s650_s5 = inlined_call_operand.hbm [shape: f32[16,128], index: 5, kind: output, shape index: {}]  }
   0x1   :  { %11 = vsyncpa [#allocation6], 0 }
   0x2   :  { %12 = vsyncpa [#allocation4], 0  ;;  %s535_s18 = smov [#allocation5]   ;;  %s536_s20 = smov [#allocation2]  }
   0x3   :  { %s30_s19 = sshll.u32 %s535_s18, 4  ;;  %s18_s21 = sshll.u32 %s536_s20, 4  ;;  %s31_s19 = int_to_ptr.vmem [resolvable:$true] %s30_s19  ;;  %s575_s21 = int_to_ptr.vmem [resolvable:$true] %s18_s21 }
   0x4   :  { %s441_s24 = scalar_lea.hbm %s646_s1, 1024 }
   0x5   :  { %p442_p0 = scmp.ne.s32.totalorder %s646_s1, %s441_s24  ;;  %p445_p1 = scmp.lt.u32.totalorder %s441_s24, %s646_s1 }
   0x7   :  { %p447_p2 = pnand %p445_p1, %p442_p0 }
   0x9   :  { %450 = shalt.err (!%p447_p2)
}
   0xa   :  { %s451_s29 = scalar_lea.vmem %s31_s19, 1024  ;;  %p456_p4 = scmp.lt.s32.totalorder %s31_s19, %s31_s19 }
   0xb   :  { %p452_p3 = scmp.ne.s32.totalorder %s31_s19, %s451_s29  ;;  %p457_p5 = scmp.lt.s32.totalorder %s451_s29, %s451_s29 }
   0xd   :  { %p458_p6 = por %p457_p5, %p456_p4 }
   0xf   :  { %p459_p7 = pnand %p458_p6, %p452_p3 }
  0x11   :  { %462 = shalt.err (!%p459_p7)
}
  0x12   :  { %s537_s30 = smov 64   ;;  %s538_s6 = smov 4  }
  0x13   :  { %36 = dma.hbm_to_vmem [thread:$0]  %s646_s1, 1024, %s31_s19, [#allocation6], %s537_s30, %s537_s30, %s538_s6  }
  0x14   :  { %s463_s11 = scalar_lea.hbm %s645_s0, 128 }
  0x15   :  { %p464_p8 = scmp.ne.s32.totalorder %s645_s0, %s463_s11  ;;  %p467_p9 = scmp.lt.u32.totalorder %s463_s11, %s645_s0 }
  0x17   :  { %p469_p10 = pnand %p467_p9, %p464_p8 }
  0x19   :  { %472 = shalt.err (!%p469_p10)
}
  0x1a   :  { %s473_s16 = scalar_lea.vmem %s575_s21, 128  ;;  %p478_p12 = scmp.lt.s32.totalorder %s575_s21, %s575_s21 }
  0x1b   :  { %p474_p11 = scmp.ne.s32.totalorder %s575_s21, %s473_s16  ;;  %p479_p13 = scmp.lt.s32.totalorder %s473_s16, %s473_s16 }
  0x1d   :  { %p480_p0 = por %p479_p13, %p478_p12 }
  0x1f   :  { %p481_p1 = pnand %p480_p0, %p474_p11 }
  0x21   :  { %484 = shalt.err (!%p481_p1)
}
  0x22   :  { %24 = dma.hbm_to_vmem [thread:$0]  %s645_s0, 128, %s575_s21, [#allocation3], %s537_s30, %s537_s30, %s538_s6  }
  0x23   :  { %s539_s18 = smov [#allocation7]   ;;  %s485_s23 = scalar_lea.hbm %s648_s3, 1024 }
  0x24   :  { %s44_s19 = sshll.u32 %s539_s18, 4  ;;  %p486_p2 = scmp.ne.s32.totalorder %s648_s3, %s485_s23  ;;  %s45_s19 = int_to_ptr.vmem [resolvable:$true] %s44_s19 }
  0x25   :  { %p489_p3 = scmp.lt.u32.totalorder %s485_s23, %s648_s3 }
  0x27   :  { %p491_p4 = pnand %p489_p3, %p486_p2 }
  0x29   :  { %494 = shalt.err (!%p491_p4)
}
  0x2a   :  { %s495_s28 = scalar_lea.vmem %s45_s19, 1024  ;;  %p500_p6 = scmp.lt.s32.totalorder %s45_s19, %s45_s19 }
  0x2b   :  { %p496_p5 = scmp.ne.s32.totalorder %s45_s19, %s495_s28  ;;  %p501_p7 = scmp.lt.s32.totalorder %s495_s28, %s495_s28 }
  0x2d   :  { %p502_p8 = por %p501_p7, %p500_p6 }
  0x2f   :  { %p503_p9 = pnand %p502_p8, %p496_p5 }
  0x31   :  { %506 = shalt.err (!%p503_p9)
}
  0x32   :  { %50 = dma.hbm_to_vmem [thread:$0]  %s648_s3, 1024, %s45_s19, [#allocation6], %s537_s30, %s537_s30, %s538_s6  }
  0x33   :  { %529 = dma.done.wait [#allocation3], 128  }
  0x34   :  { %530 = vsyncadd [#allocation3], 4294967168 }
  0x35   :  { %531 = dma.done.wait [#allocation6], 2048  }
  0x36   :  { %532 = vsyncadd [#allocation6], 4294965248  ;;  %v540_v0 = vmov 0.0   ;;  %vm541_vm0 = vmmov 0   ;;  %v424_v1 = vld [vmem:[#allocation5] sm:$0xff]   ;;  %v425_v2 = vld [vmem:[#allocation5 + $0x8] sm:$0xff]  }
  0x37   :  { %374 = vmatprep.subr.bf16.mxu0 %v540_v0  ;;  %390 = vmatprep.mubr.msk.bf16.mxu0 %vm541_vm0, %v540_v0  ;;  %v426_v3 = vld [vmem:[#allocation5 + $0x10] sm:$0xff]   ;;  %v433_v4 = vld [vmem:[#allocation7] sm:$0xff]   ;;  %v427_v5 = vld [vmem:[#allocation5 + $0x18] sm:$0xff]   ;;  %s542_s7 = smov [#allocation8]  }
  0x38   :  { %394 = vmatprep.subr.bf16.mxu1 %v540_v0  ;;  %410 = vmatprep.mubr.msk.bf16.mxu1 %vm541_vm0, %v540_v0  ;;  %v434_v6 = vld [vmem:[#allocation7 + $0x8] sm:$0xff]   ;;  %v428_v7 = vld [vmem:[#allocation5 + $0x20] sm:$0xff]   ;;  %v435_v8 = vld [vmem:[#allocation7 + $0x10] sm:$0xff]   ;;  %s324_s8 = sshll.u32 %s542_s7, 4  ;;  %s325_s8 = int_to_ptr.vmem [resolvable:$true] %s324_s8 }
  0x39   :  { %375 = vmatpush3.bf16.msra.mxu0 %v424_v1  ;;  %395 = vmatpush3.bf16.msra.mxu1 %v433_v4  ;;  %v429_v9 = vld [vmem:[#allocation5 + $0x28] sm:$0xff]   ;;  %v436_v10 = vld [vmem:[#allocation7 + $0x18] sm:$0xff]   ;;  %v430_v11 = vld [vmem:[#allocation5 + $0x30] sm:$0xff]   ;;  %p512_p11 = scmp.lt.s32.totalorder %s325_s8, %s325_s8 }
  0x3a   :  { %376 = vmatprep.subr.bf16.mxu0 %v540_v0  ;;  %396 = vmatprep.subr.bf16.mxu1 %v540_v0  ;;  %v437_v12 = vld [vmem:[#allocation7 + $0x20] sm:$0xff]   ;;  %v431_v13 = vld [vmem:[#allocation5 + $0x38] sm:$0xff]   ;;  %v438_v14 = vld [vmem:[#allocation7 + $0x28] sm:$0xff]  }
  0x3b   :  { %v432_v15 = vld [vmem:[#allocation2] sm:$0xff]   ;;  %v439_v16 = vld [vmem:[#allocation7 + $0x30] sm:$0xff]  }
  0x3c   :  { %v440_v17 = vld [vmem:[#allocation7 + $0x38] sm:$0xff]  }
  0x3d   :  { %377 = vmatpush3.bf16.msra.mxu0 %v425_v2  ;;  %397 = vmatpush3.bf16.msra.mxu1 %v434_v6  ;;  %v337_v18 = vld [vmem:[%s647_s2] ss:$0 sm:$0xff]  ;;  %s507_s2 = scalar_lea.vmem %s325_s8, 256 }
  0x3e   :  { %378 = vmatprep.subr.bf16.mxu0 %v540_v0  ;;  %398 = vmatprep.subr.bf16.mxu1 %v540_v0  ;;  %v355_v29 = vld [vmem:[%s649_s4] ss:$0 sm:$0xff]  ;;  %p508_p10 = scmp.ne.s32.totalorder %s325_s8, %s507_s2  ;;  %p513_p12 = scmp.lt.s32.totalorder %s507_s2, %s507_s2 }
  0x40   :  { %p514_p13 = por %p513_p12, %p512_p11 }
  0x41   :  { %379 = vmatpush3.bf16.msra.mxu0 %v426_v3  ;;  %399 = vmatpush3.bf16.msra.mxu1 %v435_v8 }
  0x42   :  { %380 = vmatprep.subr.bf16.mxu0 %v540_v0  ;;  %400 = vmatprep.subr.bf16.mxu1 %v540_v0  ;;  %p515_p0 = pnand %p514_p13, %p508_p10 }
  0x45   :  { %381 = vmatpush3.bf16.msra.mxu0 %v427_v5  ;;  %401 = vmatpush3.bf16.msra.mxu1 %v436_v10 }
  0x46   :  { %382 = vmatprep.subr.bf16.mxu0 %v540_v0  ;;  %402 = vmatprep.subr.bf16.mxu1 %v540_v0 }
  0x49   :  { %383 = vmatpush3.bf16.msra.mxu0 %v428_v7  ;;  %403 = vmatpush3.bf16.msra.mxu1 %v437_v12 }
  0x4a   :  { %384 = vmatprep.subr.bf16.mxu0 %v540_v0  ;;  %404 = vmatprep.subr.bf16.mxu1 %v540_v0 }
  0x4d   :  { %385 = vmatpush3.bf16.msra.mxu0 %v429_v9  ;;  %405 = vmatpush3.bf16.msra.mxu1 %v438_v14 }
  0x4e   :  { %386 = vmatprep.subr.bf16.mxu0 %v540_v0  ;;  %406 = vmatprep.subr.bf16.mxu1 %v540_v0 }
  0x51   :  { %387 = vmatpush3.bf16.msra.mxu0 %v430_v11  ;;  %407 = vmatpush3.bf16.msra.mxu1 %v439_v16 }
  0x52   :  { %388 = vmatprep.subr.bf16.mxu0 %v540_v0  ;;  %408 = vmatprep.subr.bf16.mxu1 %v540_v0 }
  0x55   :  { %389 = vmatpush3.bf16.msra.mxu0 %v431_v13  ;;  %409 = vmatpush3.bf16.msra.mxu1 %v440_v17 }
  0x58   :  { %391 = vmatmul.mubr.bf16.vlgmr.msra.gmra.mrb[0].mxu0 %v432_v15 }
 0x12b   :  { %v182_v19 = vpop.f32.mrb[0].mxu0 }
 0x12c   :  { %v183_v20 = vadd.f32 %v337_v18, %v182_v19  ;;  %v392_v21 = vpop.f32.mrb[1].mxu0 }
 0x12d   :  { %v185_v22 = vpop.f32.mrb[2].mxu0 }
 0x12e   :  { %v186_v23 = vadd.f32 %v337_v18, %v185_v22  ;;  %v393_v24 = vpop.f32.mrb[3].mxu0  ;;  %v189_v25 = vmax.f32 %v183_v20, 0.0 }
 0x130   :  { %v190_v26 = vmax.f32 %v186_v23, 0.0 }
 0x132   :  { %v191_v27 = vpack.c.bf16 %v190_v26, %v189_v25 }
 0x134   :  { %411 = vmatmul.mubr.bf16.vlgmr.msra.gmra.mrb[0].mxu1 %v191_v27 }
 0x207   :  { %v292_v28 = vpop.f32.mrb[0].mxu1 }
 0x208   :  { %v412_v30 = vpop.f32.mrb[1].mxu1  ;;  %v315_v33 = vadd.f32 %v355_v29, %v292_v28 }
 0x209   :  { %v295_v31 = vpop.f32.mrb[2].mxu1 }
 0x20a   :  { %v413_v32 = vpop.f32.mrb[3].mxu1  ;;  %v316_v34 = vadd.f32 %v355_v29, %v295_v31  ;;  %317 = vst [vmem:[#allocation8] sm:$0xff] %v315_v33 }
 0x20c   :  { %318 = vst [vmem:[#allocation8 + $0x8] sm:$0xff] %v316_v34 }
 0x20d   :  { %518 = shalt.err (!%p515_p0)
}
 0x20e   :  { %s519_s4 = scalar_lea.hbm %s650_s5, 256 }
 0x20f   :  { %p520_p1 = scmp.ne.s32.totalorder %s650_s5, %s519_s4  ;;  %p523_p2 = scmp.lt.u32.totalorder %s519_s4, %s650_s5 }
 0x211   :  { %p525_p3 = pnand %p523_p2, %p520_p1 }
 0x213   :  { %528 = shalt.err (!%p525_p3)
}
 0x214   :  { %s543_s15 = smov 128   ;;  %s544_s16 = smov 8  }
 0x215   :  { %330 = dma.vmem_to_hbm [thread:$0]  %s325_s8, 256, %s650_s5, [#allocation4], %s543_s15, %s543_s15, %s544_s16  }
 0x216   :  { %533 = dma.done.wait [#allocation4], 256  }
 0x217   :  { %534 = vsyncadd [#allocation4], 4294967040 }
 0x218   :  { %334 = vsyncpa [#allocation3], 1 }
 0x219   :  { %335 = vsyncpa [#allocation6], 1 }
 0x21a   :  { %336 = vsyncpa [#allocation4], 1 }

</bundles_post_ra>
